<compile_context>
chip_gen: v6e
topology: v6e:2x2x1
jax: 0.10.0
libtpu: 0.0.40
codegen_flags: <defaults>
</compile_context>

<pallas_src>
import functools

import jax
import jax.numpy as jnp
from jax.experimental import pallas as pl
from jax.experimental.pallas import tpu as pltpu

NEG_INF = -1e30


# ----------------------------- helpers -----------------------------

def _ceil_to(x, m):
    return ((x + m - 1) // m) * m


def _pad_to(x, shape):
    pads = [(0, s - d) for d, s in zip(x.shape, shape)]
    if all(p == (0, 0) for p in pads):
        return x
    return jnp.pad(x, pads)


# ----------------------------- tiled linear -----------------------------

def _linear_kernel(x_ref, wT_ref, b_ref, o_ref, acc_ref, *, relu):
    @pl.when(pl.program_id(1) == 0)
    def _():
        acc_ref[...] = jnp.zeros_like(acc_ref)

    acc_ref[...] += jnp.dot(x_ref[...], wT_ref[...],
                            preferred_element_type=jnp.float32)

    @pl.when(pl.program_id(1) == pl.num_programs(1) - 1)
    def _():
        y = acc_ref[...] + b_ref[...]
        if relu:
            y = jnp.maximum(y, 0.0)
        o_ref[...] = y.astype(o_ref.dtype)


def pallas_linear(x, wT, b, *, relu=False, out_dtype=jnp.float32,
                  bm_max=256, bk_max=512):
    """y = x @ wT + b (optionally ReLU), tiled over M and K, bf16 MXU operands."""
    M, K = x.shape
    N = wT.shape[1]
    M_p = _ceil_to(M, 8)
    bm = M_p if M_p <= bm_max else bm_max
    M_p = _ceil_to(M_p, bm)
    K_p = _ceil_to(K, 128)
    bk = K_p if K_p <= bk_max else bk_max
    K_p = _ceil_to(K_p, bk)
    N_p = _ceil_to(N, 128)

    x_p = _pad_to(x, (M_p, K_p)).astype(jnp.bfloat16)
    wT_p = _pad_to(wT, (K_p, N_p)).astype(jnp.bfloat16)
    b_p = _pad_to(jnp.reshape(b, (1, -1)), (1, N_p)).astype(jnp.float32)

    out = pl.pallas_call(
        functools.partial(_linear_kernel, relu=relu),
        grid=(M_p // bm, K_p // bk),
        in_specs=[
            pl.BlockSpec((bm, bk), lambda i, k: (i, k)),
            pl.BlockSpec((bk, N_p), lambda i, k: (k, 0)),
            pl.BlockSpec((1, N_p), lambda i, k: (0, 0)),
        ],
        out_specs=pl.BlockSpec((bm, N_p), lambda i, k: (i, 0)),
        out_shape=jax.ShapeDtypeStruct((M_p, N_p), out_dtype),
        scratch_shapes=[pltpu.VMEM((bm, N_p), jnp.float32)],
        compiler_params=pltpu.CompilerParams(
            dimension_semantics=("parallel", "arbitrary")),
    )(x_p, wT_p, b_p)
    return out[:M, :N]


# ----------------------------- align question embedding -----------------------------

def _align_kernel(ctxp_ref, qstp_ref, qstv_ref, qmask_ref, o_ref):
    # ctxp: (bt, Tc_p, E_p) bf16, qstp: (bt, Tq_p, E_p) bf16,
    # qstv: (bt, Tq_p, E_p) f32, qmask: (bt, 1, Tq_p) additive f32
    scores = jnp.einsum("bte,bqe->btq", ctxp_ref[...], qstp_ref[...],
                        preferred_element_type=jnp.float32)
    scores = scores + qmask_ref[...]
    m = jnp.max(scores, axis=-1, keepdims=True)
    e = jnp.exp(scores - m)
    alpha = e * pl.reciprocal(jnp.sum(e, axis=-1, keepdims=True), approx=True)
    o_ref[...] = jnp.einsum("btq,bqe->bte", alpha, qstv_ref[...],
                            preferred_element_type=jnp.float32)


def align_question_embedding(ctx_embed, qst_embed, question_mask, wT, b):
    B, Tc, E = ctx_embed.shape
    Tq = qst_embed.shape[1]
    E_p = _ceil_to(E, 128)
    Tc_p = _ceil_to(Tc, 8)
    Tq_p = _ceil_to(Tq, 8)
    bt = min(B, 8)
    B_p = _ceil_to(B, bt)

    # Hoisted ReLU projections: big-M tiled matmuls (lane-dense E_p output).
    wT_p = _pad_to(wT, (E_p, E_p))
    b_p = _pad_to(jnp.reshape(b, (1, -1)), (1, E_p))
    ctx_p = pallas_linear(ctx_embed.reshape(B * Tc, E), wT_p, b_p,
                          relu=True, out_dtype=jnp.bfloat16)   # (B*Tc, E_p)
    qst_p = pallas_linear(qst_embed.reshape(B * Tq, E), wT_p, b_p,
                          relu=True, out_dtype=jnp.bfloat16)   # (B*Tq, E_p)

    ctx_p3 = _pad_to(ctx_p.reshape(B, Tc, E_p), (B_p, Tc_p, E_p))
    qst_p3 = _pad_to(qst_p.reshape(B, Tq, E_p), (B_p, Tq_p, E_p))
    qst_v3 = _pad_to(qst_embed.astype(jnp.float32), (B_p, Tq_p, E_p))
    maskb = _pad_to(question_mask.astype(jnp.float32).reshape(B, 1, Tq),
                    (B_p, 1, Tq_p))
    mask_add = (1.0 - maskb) * NEG_INF

    out = pl.pallas_call(
        _align_kernel,
        grid=(B_p // bt,),
        in_specs=[
            pl.BlockSpec((bt, Tc_p, E_p), lambda i: (i, 0, 0)),
            pl.BlockSpec((bt, Tq_p, E_p), lambda i: (i, 0, 0)),
            pl.BlockSpec((bt, Tq_p, E_p), lambda i: (i, 0, 0)),
            pl.BlockSpec((bt, 1, Tq_p), lambda i: (i, 0, 0)),
        ],
        out_specs=pl.BlockSpec((bt, Tc_p, E_p), lambda i: (i, 0, 0)),
        out_shape=jax.ShapeDtypeStruct((B_p, Tc_p, E_p), jnp.float32),
        compiler_params=pltpu.CompilerParams(dimension_semantics=("parallel",)),
    )(ctx_p3, qst_p3, qst_v3, mask_add)
    return out[:B, :Tc, :E]


# ----------------------------- question self-attention pooling -----------------------------

def _qpool_kernel(q_ref, mask_ref, w_ref, o_ref):
    # q: (B, Tq_p, D_p) f32, mask: (B, Tq_p) additive f32, w: (1, 1, D_p)
    q = q_ref[...]
    scores = jnp.sum(q * w_ref[...], axis=-1) + mask_ref[...]        # VPU + lane reduce
    m = jnp.max(scores, axis=-1, keepdims=True)
    e = jnp.exp(scores - m)
    alpha = e * pl.reciprocal(jnp.sum(e, axis=-1, keepdims=True), approx=True)
    o_ref[...] = jnp.sum(q * alpha[:, :, None], axis=1)              # (B, D_p)


def question_attn_pool(qst_hidden, question_mask, w, b):
    B, Tq, D = qst_hidden.shape
    D_p = _ceil_to(D, 128)
    Tq_p = _ceil_to(Tq, 8)
    q = _pad_to(qst_hidden.astype(jnp.float32), (B, Tq_p, D_p))
    w3 = _pad_to(jnp.reshape(w, (1, 1, D)), (1, 1, D_p)).astype(jnp.float32)
    maskb = _pad_to(question_mask.astype(jnp.float32), (B, Tq_p))
    # scalar bias of the score linear cancels in softmax; folded in for fidelity
    mask_add = (1.0 - maskb) * NEG_INF + jnp.reshape(b, ())

    out = pl.pallas_call(
        _qpool_kernel,
        out_shape=jax.ShapeDtypeStruct((B, D_p), jnp.float32),
    )(q, mask_add, w3)
    return out[:, :D]


# ----------------------------- fused start/end bilinear attention -----------------------------

def _bilinear_kernel(ctx_ref, qv_ref, mask_ref, ws_ref, bs_ref, we_ref, be_ref,
                     os_ref, oe_ref):
    q = qv_ref[...]                                           # (bt, D_p)
    ctx = ctx_ref[...]                                        # (bt, Tc_p, D_p)
    mask = mask_ref[...]                                      # (bt, Tc_p) additive
    qp_s = jnp.dot(q, ws_ref[...], preferred_element_type=jnp.float32) + bs_ref[...]
    qp_e = jnp.dot(q, we_ref[...], preferred_element_type=jnp.float32) + be_ref[...]
    s_s = jnp.sum(ctx * qp_s[:, None, :], axis=-1) + mask     # VPU + lane reduce
    s_e = jnp.sum(ctx * qp_e[:, None, :], axis=-1) + mask

    def log_softmax(s):
        m = jnp.max(s, axis=-1, keepdims=True)
        sh = s - m
        return sh - jnp.log(jnp.sum(jnp.exp(sh), axis=-1, keepdims=True))

    os_ref[...] = log_softmax(s_s)
    oe_ref[...] = log_softmax(s_e)


def bilinear_start_end(ctx_enc, qst_vec, context_mask, ws_T, bs, we_T, be):
    B, Tc, D = ctx_enc.shape
    D_p = _ceil_to(D, 128)
    Tc_p = _ceil_to(Tc, 128)          # lane-dense output last dim
    bt = min(B, 8)
    B_p = _ceil_to(B, bt)

    ctx = _pad_to(ctx_enc.astype(jnp.float32), (B_p, Tc_p, D_p))
    qv = _pad_to(qst_vec.astype(jnp.float32), (B_p, D_p))
    wsp = _pad_to(ws_T, (D_p, D_p)).astype(jnp.float32)
    wep = _pad_to(we_T, (D_p, D_p)).astype(jnp.float32)
    bsp = _pad_to(jnp.reshape(bs, (1, -1)), (1, D_p)).astype(jnp.float32)
    bep = _pad_to(jnp.reshape(be, (1, -1)), (1, D_p)).astype(jnp.float32)
    maskb = _pad_to(context_mask.astype(jnp.float32), (B_p, Tc_p))
    mask_add = (1.0 - maskb) * NEG_INF

    start, end = pl.pallas_call(
        _bilinear_kernel,
        grid=(B_p // bt,),
        in_specs=[
            pl.BlockSpec((bt, Tc_p, D_p), lambda i: (i, 0, 0)),
            pl.BlockSpec((bt, D_p), lambda i: (i, 0)),
            pl.BlockSpec((bt, Tc_p), lambda i: (i, 0)),
            pl.BlockSpec((D_p, D_p), lambda i: (0, 0)),
            pl.BlockSpec((1, D_p), lambda i: (0, 0)),
            pl.BlockSpec((D_p, D_p), lambda i: (0, 0)),
            pl.BlockSpec((1, D_p), lambda i: (0, 0)),
        ],
        out_specs=[pl.BlockSpec((bt, Tc_p), lambda i: (i, 0)),
                   pl.BlockSpec((bt, Tc_p), lambda i: (i, 0))],
        out_shape=(jax.ShapeDtypeStruct((B_p, Tc_p), jnp.float32),
                   jax.ShapeDtypeStruct((B_p, Tc_p), jnp.float32)),
        compiler_params=pltpu.CompilerParams(dimension_semantics=("parallel",)),
    )(ctx, qv, mask_add, wsp, bsp, wep, bep)
    return start[:B, :Tc], end[:B, :Tc]


# ----------------------------- BiLSTM (Pallas recurrence) -----------------------------

def _bilstm_cell_kernel(xpf_ref, xpb_ref, whf_ref, whb_ref, of_ref, ob_ref,
                        hf, cf, hb, cb):
    @pl.when(pl.program_id(0) == 0)
    def _():
        for r in (hf, cf, hb, cb):
            r[...] = jnp.zeros_like(r)

    def cell(xp_ref, wh_ref, h_ref, c_ref, o_ref):
        h = h_ref[...]

        def gate(j):
            return xp_ref[0, j] + jnp.dot(h, wh_ref[j],
                                          preferred_element_type=jnp.float32)

        i = jax.nn.sigmoid(gate(0))          # PyTorch gate order: i, f, g, o
        f = jax.nn.sigmoid(gate(1))
        g = jnp.tanh(gate(2))
        o = jax.nn.sigmoid(gate(3))
        c = f * c_ref[...] + i * g
        h_new = o * jnp.tanh(c)
        c_ref[...] = c
        h_ref[...] = h_new
        o_ref[0] = h_new

    cell(xpf_ref, whf_ref, hf, cf, of_ref)
    cell(xpb_ref, whb_ref, hb, cb, ob_ref)


def lstm_layer_bidir(x_tm, lp):
    """x_tm: (T, B, in) time-major.  Returns (T, B, 2H)."""
    T, B, _ = x_tm.shape
    H = lp["w_hh_f"].shape[1]

    # Fused fwd/bwd input projections: one tiled matmul per layer.
    w_cat_T = jnp.concatenate([lp["w_ih_f"], lp["w_ih_b"]], axis=0).T     # (in, 8H)
    b_cat = jnp.concatenate([lp["b_ih_f"] + lp["b_hh_f"],
                             lp["b_ih_b"] + lp["b_hh_b"]])                # (8H,)
    xp = pallas_linear(x_tm.reshape(T * B, -1), w_cat_T, b_cat)           # (T*B, 8H)
    xp = xp.reshape(T, B, 8, H).transpose(0, 2, 1, 3)                     # (T, 8, B, H)
    xp_f, xp_b = xp[:, :4], xp[:, 4:]                                     # (T, 4, B, H)

    whT_f = jnp.transpose(lp["w_hh_f"].reshape(4, H, H), (0, 2, 1))       # (4, H, H)
    whT_b = jnp.transpose(lp["w_hh_b"].reshape(4, H, H), (0, 2, 1))

    hs_f, hs_b = pl.pallas_call(
        _bilstm_cell_kernel,
        grid=(T,),
        in_specs=[
            pl.BlockSpec((1, 4, B, H), lambda t: (t, 0, 0, 0)),
            pl.BlockSpec((1, 4, B, H), lambda t: (T - 1 - t, 0, 0, 0)),
            pl.BlockSpec((4, H, H), lambda t: (0, 0, 0)),
            pl.BlockSpec((4, H, H), lambda t: (0, 0, 0)),
        ],
        out_specs=[
            pl.BlockSpec((1, B, H), lambda t: (t, 0, 0)),
            pl.BlockSpec((1, B, H), lambda t: (T - 1 - t, 0, 0)),
        ],
        out_shape=(jax.ShapeDtypeStruct((T, B, H), jnp.float32),
                   jax.ShapeDtypeStruct((T, B, H), jnp.float32)),
        scratch_shapes=[pltpu.VMEM((B, H), jnp.float32)] * 4,
        compiler_params=pltpu.CompilerParams(dimension_semantics=("arbitrary",)),
    )(xp_f, xp_b, whT_f, whT_b)
    return jnp.concatenate([hs_f, hs_b], axis=-1)


def stacked_bilstm(x, layer_params):
    """x: (B, T, in).  DrQA StackedBiLSTM concatenates every layer's output."""
    x_tm = jnp.swapaxes(x, 0, 1)       # time-major
    outs, inp = [], x_tm
    for lp in layer_params:
        out = lstm_layer_bidir(inp, lp)
        outs.append(out)
        inp = out
    return jnp.swapaxes(jnp.concatenate(outs, axis=-1), 0, 1)


# ----------------------------- DrQA forward -----------------------------

def drqa_forward(params, inputs):
    context = inputs["context_ids"]
    question = inputs["question_ids"]
    context_mask = inputs["context_mask"]
    question_mask = inputs["question_mask"]

    # lengths (computed for parity; packing not replicated — see module TODO)
    _context_lengths = jnp.count_nonzero(context_mask, axis=1)
    _question_lengths = jnp.count_nonzero(question_mask, axis=1)

    emb = params["embedding"]
    ctx_embed = jnp.take(emb, context, axis=0)     # dropout = identity (eval)
    qst_embed = jnp.take(emb, question, axis=0)

    align_embed = align_question_embedding(
        ctx_embed, qst_embed, question_mask,
        params["align_wT"], params["align_b"])

    ctx_bilstm_input = jnp.concatenate([ctx_embed, align_embed], axis=2)
    ctx_encoded = stacked_bilstm(ctx_bilstm_input, params["ctx_lstm"])

    qst_hidden = stacked_bilstm(qst_embed, params["qst_lstm"])
    qst_encoded = question_attn_pool(
        qst_hidden, question_mask, params["qattn_w"], params["qattn_b"])

    start_scores, end_scores = bilinear_start_end(
        ctx_encoded, qst_encoded, context_mask,
        params["start_wT"], params["start_b"],
        params["end_wT"], params["end_b"])
    return start_scores, end_scores


# ----------------------------- setup / main -----------------------------

def init_lstm_layer(key, in_dim, H):
    ks = jax.random.split(key, 8)

    def mk(k, shape):
        return jax.random.uniform(k, shape, jnp.float32, -0.1, 0.1)

    return dict(
        w_ih_f=mk(ks[0], (4 * H, in_dim)), w_hh_f=mk(ks[1], (4 * H, H)),
        b_ih_f=mk(ks[2], (4 * H,)), b_hh_f=mk(ks[3], (4 * H,)),
        w_ih_b=mk(ks[4], (4 * H, in_dim)), w_hh_b=mk(ks[5], (4 * H, H)),
        b_ih_b=mk(ks[6], (4 * H,)), b_hh_b=mk(ks[7], (4 * H,)),
    )


if __name__ == "__main__":
    B, Tc, Tq = 2, 16, 8
    EMB, H, L = 32, 16, 2
    VOCAB, PAD = 50, 0
    D = H * L * 2  # hidden_dim * num_layers * num_directions

    key = jax.random.PRNGKey(0)
    ks = jax.random.split(key, 16)

    emb = jax.random.normal(ks[0], (VOCAB, EMB), jnp.float32) * 0.5
    emb = emb.at[PAD].set(0.0)

    params = dict(
        embedding=emb,
        align_wT=jax.random.normal(ks[1], (EMB, EMB), jnp.float32) * 0.1,
        align_b=jax.random.normal(ks[2], (1, EMB), jnp.float32) * 0.1,
        ctx_lstm=[init_lstm_layer(ks[3], EMB * 2, H),
                  init_lstm_layer(ks[4], 2 * H, H)],
        qst_lstm=[init_lstm_layer(ks[5], EMB, H),
                  init_lstm_layer(ks[6], 2 * H, H)],
        qattn_w=jax.random.normal(ks[7], (1, D), jnp.float32) * 0.1,
        qattn_b=jax.random.normal(ks[8], (1, 1), jnp.float32) * 0.1,
        start_wT=jax.random.normal(ks[9], (D, D), jnp.float32) * 0.1,
        start_b=jax.random.normal(ks[10], (1, D), jnp.float32) * 0.1,
        end_wT=jax.random.normal(ks[11], (D, D), jnp.float32) * 0.1,
        end_b=jax.random.normal(ks[12], (1, D), jnp.float32) * 0.1,
    )

    ctx_len = jnp.array([Tc, 12])
    qst_len = jnp.array([Tq, 6])
    context_mask = (jnp.arange(Tc)[None, :] < ctx_len[:, None]).astype(jnp.int32)
    question_mask = (jnp.arange(Tq)[None, :] < qst_len[:, None]).astype(jnp.int32)
    context_ids = jax.random.randint(ks[13], (B, Tc), 1, VOCAB) * context_mask
    question_ids = jax.random.randint(ks[14], (B, Tq), 1, VOCAB) * question_mask

    inputs = dict(context_ids=context_ids, question_ids=question_ids,
                  context_mask=context_mask, question_mask=question_mask)

    start_scores, end_scores = drqa_forward(params, inputs)
    jax.block_until_ready((start_scores, end_scores))

    assert start_scores.shape == (B, Tc) and end_scores.shape == (B, Tc)
    assert bool(jnp.all(jnp.isfinite(start_scores)))
    assert bool(jnp.all(jnp.isfinite(end_scores)))
    print("KERNEL_OK")
</pallas_src>

<mosaic_0001>
module attributes {stable_mosaic.version = 11 : i64} {
  func.func @_linear_kernel(%arg0: i32, %arg1: i32, %arg2: memref<32x128xbf16, #tpu.memory_space<vmem>>, %arg3: memref<128x128xbf16, #tpu.memory_space<vmem>>, %arg4: memref<1x128xf32, #tpu.memory_space<vmem>>, %arg5: memref<32x128xbf16, #tpu.memory_space<vmem>>, %arg6: memref<32x128xf32, #tpu.memory_space<vmem>>) attributes {dimension_semantics = [#tpu.dimension_semantics<parallel>, #tpu.dimension_semantics<arbitrary>], iteration_bounds = array<i64: 1, 1>, scalar_prefetch = 0 : i64, scratch_operands = 1 : i64, tpu.core_type = #tpu.core_type<tc>, window_params = [{transform_indices = @transform_0, window_bounds = array<i64: 32, 128>}, {transform_indices = @transform_1, window_bounds = array<i64: 128, 128>}, {pipeline_mode = #tpu.pipeline_mode<synchronous>, transform_indices = @transform_2, window_bounds = array<i64: 1, 128>}, {transform_indices = @transform_3, window_bounds = array<i64: 32, 128>}]} {
    %c0_i32 = arith.constant 0 : i32
    %0 = arith.cmpi eq, %arg1, %c0_i32 : i32
    %1 = arith.extui %0 : i1 to i32
    %c0_i32_0 = arith.constant 0 : i32
    %2 = arith.cmpi ne, %1, %c0_i32_0 : i32
    scf.if %2 {
      %cst_10 = arith.constant 0.000000e+00 : f32
      %12 = vector.broadcast %cst_10 : f32 to vector<32x128xf32>
      %c0_11 = arith.constant 0 : index
      %c0_12 = arith.constant 0 : index
      %13 = vector.load %arg6[%c0_11, %c0_12] : memref<32x128xf32, #tpu.memory_space<vmem>>, vector<32x128xf32>
      tpu.vector_store %arg6[%c0_11, %c0_12], %12 {strides = array<i32>} : memref<32x128xf32, #tpu.memory_space<vmem>>, vector<32x128xf32>,
    } else {
    }
    %c0 = arith.constant 0 : index
    %c0_1 = arith.constant 0 : index
    %3 = vector.load %arg6[%c0, %c0_1] : memref<32x128xf32, #tpu.memory_space<vmem>>, vector<32x128xf32>
    %c0_2 = arith.constant 0 : index
    %c0_3 = arith.constant 0 : index
    %4 = vector.load %arg2[%c0_2, %c0_3] : memref<32x128xbf16, #tpu.memory_space<vmem>>, vector<32x128xbf16>
    %c0_4 = arith.constant 0 : index
    %c0_5 = arith.constant 0 : index
    %5 = vector.load %arg3[%c0_4, %c0_5] : memref<128x128xbf16, #tpu.memory_space<vmem>>, vector<128x128xbf16>
    %cst = arith.constant dense<0.000000e+00> : vector<32x128xf32>
    %6 = tpu.matmul %4, %5, %cst {dimension_numbers = #tpu.dot_dimension_numbers<[1], [0], [0], [1], [0, 0, 1, 1], [], []>} : vector<32x128xbf16>, vector<128x128xbf16>, vector<32x128xf32> -> vector<32x128xf32>
    %7 = arith.addf %3, %6 : vector<32x128xf32>
    %c0_6 = arith.constant 0 : index
    %c0_7 = arith.constant 0 : index
    %8 = vector.load %arg6[%c0_6, %c0_7] : memref<32x128xf32, #tpu.memory_space<vmem>>, vector<32x128xf32>
    tpu.vector_store %arg6[%c0_6, %c0_7], %7 {strides = array<i32>} : memref<32x128xf32, #tpu.memory_space<vmem>>, vector<32x128xf32>,
    %c0_i32_8 = arith.constant 0 : i32
    %9 = arith.cmpi eq, %arg1, %c0_i32_8 : i32
    %10 = arith.extui %9 : i1 to i32
    %c0_i32_9 = arith.constant 0 : i32
    %11 = arith.cmpi ne, %10, %c0_i32_9 : i32
    scf.if %11 {
      %c0_10 = arith.constant 0 : index
      %c0_11 = arith.constant 0 : index
      %12 = vector.load %arg6[%c0_10, %c0_11] : memref<32x128xf32, #tpu.memory_space<vmem>>, vector<32x128xf32>
      %c0_12 = arith.constant 0 : index
      %c0_13 = arith.constant 0 : index
      %13 = vector.load %arg4[%c0_12, %c0_13] : memref<1x128xf32, #tpu.memory_space<vmem>>, vector<1x128xf32>
      %14 = vector.broadcast %13 : vector<1x128xf32> to vector<32x128xf32>
      %15 = arith.addf %12, %14 : vector<32x128xf32>
      %cst_14 = arith.constant 0.000000e+00 : f32
      %16 = vector.broadcast %cst_14 : f32 to vector<32x128xf32>
      %17 = arith.maximumf %15, %16 : vector<32x128xf32>
      %18 = arith.truncf %17 : vector<32x128xf32> to vector<32x128xbf16>
      %c0_15 = arith.constant 0 : index
      %c0_16 = arith.constant 0 : index
      %19 = vector.load %arg5[%c0_15, %c0_16] : memref<32x128xbf16, #tpu.memory_space<vmem>>, vector<32x128xbf16>
      tpu.vector_store %arg5[%c0_15, %c0_16], %18 {strides = array<i32>} : memref<32x128xbf16, #tpu.memory_space<vmem>>, vector<32x128xbf16>,
    } else {
    }
    return
  }
  func.func @transform_0(%arg0: i32, %arg1: i32) -> (i32, i32) {
    %c0_i32 = arith.constant 0 : i32
    return %arg0, %arg1 : i32, i32
  }
  func.func @transform_1(%arg0: i32, %arg1: i32) -> (i32, i32) {
    %c0_i32 = arith.constant 0 : i32
    %c0_i32_0 = arith.constant 0 : i32
    return %arg1, %c0_i32 : i32, i32
  }
  func.func @transform_2(%arg0: i32, %arg1: i32) -> (i32, i32) {
    %c0_i32 = arith.constant 0 : i32
    %c0_i32_0 = arith.constant 0 : i32
    %c0_i32_1 = arith.constant 0 : i32
    return %c0_i32, %c0_i32_0 : i32, i32
  }
  func.func @transform_3(%arg0: i32, %arg1: i32) -> (i32, i32) {
    %c0_i32 = arith.constant 0 : i32
    %c0_i32_0 = arith.constant 0 : i32
    return %arg0, %c0_i32 : i32, i32
  }
}

</mosaic_0001>

<bundles_post_ra>
// kernel: tpu_custom_call.1
= control target key start
LH: loop header
LB: loop body
LE: loop exit
PB: predicated region body
PF: predicated region fallthrough
CT: control target
= control target key end

     0   :  { %8 = vsyncpa [#allocation4], 0  ;;  %s440_s0 = inlined_call_operand.hbm [shape: bf16[32,128], index: 0, kind: input, shape index: {}]   ;;  %s441_s1 = inlined_call_operand.hbm [shape: bf16[128,128], index: 1, kind: input, shape index: {}]   ;;  %s442_s2 = inlined_call_operand.vmem [shape: f32[1,128], index: 2, kind: input, shape index: {}]   ;;  %s443_s3 = inlined_call_operand.hbm [shape: bf16[32,128], index: 3, kind: output, shape index: {}]  }
   0x1   :  { %9 = vsyncpa [#allocation7], 0 }
   0x2   :  { %10 = vsyncpa [#allocation5], 0  ;;  %s394_s12 = smov [#allocation3]  }
   0x3   :  { %s16_s13 = sshll.u32 %s394_s12, 4  ;;  %s17_s13 = int_to_ptr.vmem [resolvable:$true] %s16_s13 }
   0x4   :  { %s336_s14 = scalar_lea.vmem %s17_s13, 256  ;;  %p341_p1 = scmp.lt.s32.totalorder %s17_s13, %s17_s13 }
   0x5   :  { %p337_p0 = scmp.ne.s32.totalorder %s17_s13, %s336_s14  ;;  %p342_p2 = scmp.lt.s32.totalorder %s336_s14, %s336_s14 }
   0x7   :  { %p343_p3 = por %p342_p2, %p341_p1 }
   0x9   :  { %p344_p4 = pnand %p343_p3, %p337_p0 }
   0xb   :  { %347 = shalt.err (!%p344_p4)
}
   0xc   :  { %s395_s15 = smov 64   ;;  %s396_s16 = smov 4  }
   0xd   :  { %22 = dma.hbm_to_vmem [thread:$0]  %s440_s0, 256, %s17_s13, [#allocation4], %s395_s15, %s395_s15, %s396_s16  }
   0xe   :  { %s397_s19 = smov [#allocation6]  }
   0xf   :  { %s28_s20 = sshll.u32 %s397_s19, 4  ;;  %s29_s20 = int_to_ptr.vmem [resolvable:$true] %s28_s20 }
  0x10   :  { %s356_s21 = scalar_lea.vmem %s29_s20, 1024  ;;  %p361_p6 = scmp.lt.s32.totalorder %s29_s20, %s29_s20 }
  0x11   :  { %p357_p5 = scmp.ne.s32.totalorder %s29_s20, %s356_s21  ;;  %p362_p7 = scmp.lt.s32.totalorder %s356_s21, %s356_s21 }
  0x13   :  { %p363_p8 = por %p362_p7, %p361_p6 }
  0x15   :  { %p364_p9 = pnand %p363_p8, %p357_p5 }
  0x17   :  { %367 = shalt.err (!%p364_p9)
}
  0x18   :  { %34 = dma.hbm_to_vmem [thread:$0]  %s441_s1, 1024, %s29_s20, [#allocation7], %s395_s15, %s395_s15, %s396_s16  }
  0x19   :  { %388 = dma.done.wait [#allocation4], 256  }
  0x1a   :  { %389 = vsyncadd [#allocation4], 4294967040 }
  0x1b   :  { %390 = dma.done.wait [#allocation7], 1024  }
  0x1c   :  { %391 = vsyncadd [#allocation7], 4294966272  ;;  %v318_v0 = vld [vmem:[#allocation6 + $0x38] sm:$0xff]   ;;  %v319_v1 = vld [vmem:[#allocation6 + $0x30] sm:$0xff]   ;;  %s398_s24 = smov [#allocation8]  }
  0x1d   :  { %293 = vmatprep.subr.bf16.mxu0 %v318_v0  ;;  %v320_v2 = vld [vmem:[#allocation6 + $0x28] sm:$0xff]   ;;  %v321_v3 = vld [vmem:[#allocation6 + $0x20] sm:$0xff]   ;;  %v326_v4 = vld [vmem:[#allocation3] sm:$0xff]   ;;  %s240_s25 = sshll.u32 %s398_s24, 4  ;;  %s241_s25 = int_to_ptr.vmem [resolvable:$true] %s240_s25 }
  0x1e   :  { %294 = vmatpush3.bf16.msra.mxu0 %v318_v0  ;;  %309 = vmatprep.mubr.bf16.mxu0 %v326_v4  ;;  %v322_v5 = vld [vmem:[#allocation6 + $0x18] sm:$0xff]   ;;  %v323_v6 = vld [vmem:[#allocation6 + $0x10] sm:$0xff]   ;;  %v324_v7 = vld [vmem:[#allocation6 + $0x8] sm:$0xff]   ;;  %s368_s26 = scalar_lea.vmem %s241_s25, 256  ;;  %p373_p11 = scmp.lt.s32.totalorder %s241_s25, %s241_s25 }
  0x1f   :  { %295 = vmatprep.subr.bf16.mxu0 %v319_v1  ;;  %v325_v8 = vld [vmem:[#allocation6] sm:$0xff]   ;;  %v327_v9 = vld [vmem:[#allocation3 + $0x8] sm:$0xff]   ;;  %v263_v11 = vld [vmem:[%s442_s2] ss:$0 sm:$0xff]  ;;  %p369_p10 = scmp.ne.s32.totalorder %s241_s25, %s368_s26  ;;  %p374_p12 = scmp.lt.s32.totalorder %s368_s26, %s368_s26 }
  0x21   :  { %p375_p13 = por %p374_p12, %p373_p11 }
  0x22   :  { %296 = vmatpush3.bf16.msra.mxu0 %v319_v1 }
  0x23   :  { %297 = vmatprep.subr.bf16.mxu0 %v320_v2  ;;  %p376_p0 = pnand %p375_p13, %p369_p10 }
  0x26   :  { %298 = vmatpush3.bf16.msra.mxu0 %v320_v2 }
  0x27   :  { %299 = vmatprep.subr.bf16.mxu0 %v321_v3 }
  0x2a   :  { %300 = vmatpush3.bf16.msra.mxu0 %v321_v3 }
  0x2b   :  { %301 = vmatprep.subr.bf16.mxu0 %v322_v5 }
  0x2e   :  { %302 = vmatpush3.bf16.msra.mxu0 %v322_v5 }
  0x2f   :  { %303 = vmatprep.subr.bf16.mxu0 %v323_v6 }
  0x32   :  { %304 = vmatpush3.bf16.msra.mxu0 %v323_v6 }
  0x33   :  { %305 = vmatprep.subr.bf16.mxu0 %v324_v7 }
  0x36   :  { %306 = vmatpush3.bf16.msra.mxu0 %v324_v7 }
  0x37   :  { %307 = vmatprep.subr.bf16.mxu0 %v325_v8 }
  0x3a   :  { %308 = vmatpush3.bf16.msra.mxu0 %v325_v8 }
  0x3d   :  { %310 = vmatmul.mubr.bf16.vlgmr.msra.gmra.mxu0 %v327_v9 }
  0xfd   :  { %v311_v10 = vpop.f32.mrf.mxu0 }
  0xfe   :  { %v209_v13 = vadd.f32 %v311_v10, %v263_v11 }
  0xff   :  { %v170_v12 = vpop.f32.mrf.mxu0 }
 0x100   :  { %v207_v15 = vadd.f32 %v263_v11, %v170_v12  ;;  %v213_v18 = vmax.f32 %v209_v13, 0.0 }
 0x101   :  { %v312_v14 = vpop.f32.mrf.mxu0 }
 0x102   :  { %v210_v16 = vadd.f32 %v312_v14, %v263_v11  ;;  %v211_v21 = vmax.f32 %v207_v15, 0.0 }
 0x103   :  { %v173_v17 = vpop.f32.mrf.mxu0 }
 0x104   :  { %v214_v19 = vmax.f32 %v210_v16, 0.0  ;;  %v208_v20 = vadd.f32 %v263_v11, %v173_v17 }
 0x106   :  { %v280_v22 = vpack.c.bf16 %v214_v19, %v213_v18  ;;  %v212_v23 = vmax.f32 %v208_v20, 0.0 }
 0x108   :  { %282 = vst [vmem:[#allocation8 + $0x8] sm:$0xff] %v280_v22   ;;  %v275_v24 = vpack.c.bf16 %v212_v23, %v211_v21 }
 0x10a   :  { %276 = vst [vmem:[#allocation8] sm:$0xff] %v275_v24  }
 0x10b   :  { %379 = shalt.err (!%p376_p0)
}
 0x10c   :  { %246 = dma.vmem_to_hbm [thread:$0]  %s241_s25, 256, %s443_s3, [#allocation5], %s395_s15, %s395_s15, %s396_s16  }
 0x10d   :  { %392 = dma.done.wait [#allocation5], 256  }
 0x10e   :  { %393 = vsyncadd [#allocation5], 4294967040 }
 0x10f   :  { %250 = vsyncpa [#allocation4], 1 }
 0x110   :  { %251 = vsyncpa [#allocation7], 1 }
 0x111   :  { %252 = vsyncpa [#allocation5], 1 }

</bundles_post_ra>
